<compile_context>
chip_gen: v7x
topology: tpu7x:2x2x1
jax: 0.10.0
libtpu: 0.0.40
codegen_flags: <defaults>
</compile_context>

<pallas_src>
import jax
import jax.numpy as jnp
from jax.experimental import pallas as pl
from jax.experimental.pallas import tpu as pltpu

# ----------------------------- model dims ----------------------------------
B = 2            # batch
C_IN = 4         # input channels
H = W = 16       # spatial
KH = KW = 3      # conv kernel
FEAT_DIM = 128   # "in_features" of the frozen backbone output (synthetic)
NUM_CLASSES = 2
HW = H * W
KC = KH * KW * C_IN      # 36   raw im2col contraction width
K_PAD = 128              # contraction dim zero-padded to full lane width
N_PAD = 128              # class dim zero-padded -> lane-dense output store
ROWS = B * HW            # 512  both images stacked into one matmul


# ------------------------------ kernel --------------------------------------
def _fixed_feature_mlp_kernel(patch_ref, wc_ref, bc_ref, wh_ref, bh_ref, out_ref):
    """Single fused invocation (no grid) — whole batch in one step.

    patch_ref : (B*HW, K_PAD)     zero-padded im2col patches, images stacked
    wc_ref    : (K_PAD, FEAT_DIM) conv weight as matmul operand (rows >= KC zero)
    bc_ref    : (1, FEAT_DIM)     conv bias
    wh_ref    : (FEAT_DIM, N_PAD) head weight (cols >= NUM_CLASSES zero)
    bh_ref    : (1, N_PAD)        head bias   (cols >= NUM_CLASSES zero)
    out_ref   : (B, N_PAD)        lane-dense logits (first NUM_CLASSES valid)
    """
    # Frozen backbone: conv-as-matmul (single full-width K=128 MXU pass) + bias + ReLU.
    conv = jnp.dot(patch_ref[...], wc_ref[...],
                   preferred_element_type=jnp.float32)
    conv = jnp.maximum(conv + bc_ref[...], 0.0)                      # (B*HW, F)

    # Global average pool per image: static, 8-aligned sublane slices + XLU reduce.
    feats = [jnp.mean(conv[b * HW:(b + 1) * HW, :], axis=0, keepdims=True)
             for b in range(B)]
    feat = jnp.concatenate(feats, axis=0)                            # (B, F)

    # Linear head, N padded to 128: full-width single MXU push, lane-dense store.
    y = jnp.dot(feat, wh_ref[...],
                preferred_element_type=jnp.float32) + bh_ref[...]    # (B, N_PAD)
    out_ref[...] = y.astype(out_ref.dtype)


# ------------------------------ wrapper --------------------------------------
def _im2col_patches(x_nchw):
    """NCHW image -> (B*HW, K_PAD) zero-padded patches, (kh, kw, c) ordering.

    TODO(synk): building the patches from the (B,18,18,4) padded image inside
    the kernel needs unaligned sublane slices / tile-crossing reshapes with no
    clean Mosaic lowering at this shape; kept in the XLA wrapper where it fuses
    into a single gather feeding the kernel.
    """
    x = jnp.transpose(x_nchw, (0, 2, 3, 1))                          # NHWC
    xp = jnp.pad(x, ((0, 0), (1, 1), (1, 1), (0, 0)))                # pad=1
    cols = [xp[:, kh:kh + H, kw:kw + W, :]
            for kh in range(KH) for kw in range(KW)]                 # 9 x (B,H,W,C)
    patches = jnp.concatenate(cols, axis=-1)                         # (B,H,W,KC)
    patches = patches.reshape(ROWS, KC)                              # (512, 36)
    return jnp.pad(patches, ((0, 0), (0, K_PAD - KC)))               # (512, 128)


@jax.jit
def fixed_feature_mlp(x_nchw, w_conv, b_conv, w_head, b_head):
    """Forward pass.  x_nchw: (B, C, H, W) float32 -> logits (B, NUM_CLASSES)."""
    patches = _im2col_patches(x_nchw).astype(jnp.float32)            # (512, 128)

    # torch conv weight (F, C, kh, kw) -> (kh*kw*c, F), zero-padded K -> 128.
    wc_mat = jnp.transpose(w_conv, (2, 3, 1, 0)).reshape(KC, FEAT_DIM)
    wc_pad = jnp.pad(wc_mat, ((0, K_PAD - KC), (0, 0)))              # (128, 128)
    bc_mat = b_conv.reshape(1, FEAT_DIM)                             # (1, 128)
    # torch Linear weight (out, in) -> (in, out), zero-padded N -> 128.
    wh_pad = jnp.pad(jnp.transpose(w_head, (1, 0)),
                     ((0, 0), (0, N_PAD - NUM_CLASSES)))             # (128, 128)
    bh_pad = jnp.pad(b_head.reshape(1, NUM_CLASSES),
                     ((0, 0), (0, N_PAD - NUM_CLASSES)))             # (1, 128)

    flops = 2 * ROWS * K_PAD * FEAT_DIM + 2 * B * FEAT_DIM * N_PAD
    bytes_accessed = 4 * (ROWS * K_PAD + K_PAD * FEAT_DIM + FEAT_DIM
                          + FEAT_DIM * N_PAD + N_PAD + B * N_PAD)

    vmem_spec = pl.BlockSpec(memory_space=pltpu.MemorySpace.VMEM)
    out = pl.pallas_call(
        _fixed_feature_mlp_kernel,
        out_shape=jax.ShapeDtypeStruct((B, N_PAD), jnp.float32),
        in_specs=[vmem_spec, vmem_spec, vmem_spec, vmem_spec, vmem_spec],
        out_specs=vmem_spec,
        compiler_params=pltpu.CompilerParams(
            vmem_limit_bytes=4 * 1024 * 1024),
        cost_estimate=pl.CostEstimate(flops=flops, transcendentals=0,
                                      bytes_accessed=bytes_accessed),
    )(patches, wc_pad, bc_mat, wh_pad, bh_pad)

    return out[:, :NUM_CLASSES]


# ------------------------------ main -----------------------------------------
if __name__ == "__main__":
    key = jax.random.PRNGKey(0)
    k_x, k_wc, k_bc, k_wh, k_bh = jax.random.split(key, 5)

    # deterministic synthetic parameters (stand-in for pretrained weights)
    x = jax.random.normal(k_x, (B, C_IN, H, W), dtype=jnp.float32)
    w_conv = 0.05 * jax.random.normal(k_wc, (FEAT_DIM, C_IN, KH, KW), jnp.float32)
    b_conv = 0.01 * jax.random.normal(k_bc, (FEAT_DIM,), jnp.float32)
    w_head = 0.05 * jax.random.normal(k_wh, (NUM_CLASSES, FEAT_DIM), jnp.float32)
    b_head = 0.01 * jax.random.normal(k_bh, (NUM_CLASSES,), jnp.float32)

    y = fixed_feature_mlp(x, w_conv, b_conv, w_head, b_head)
    jax.block_until_ready(y)

    # quick sanity check against a pure-JAX reference
    x_nhwc = jnp.transpose(x, (0, 2, 3, 1))
    xp = jnp.pad(x_nhwc, ((0, 0), (1, 1), (1, 1), (0, 0)))
    cols = [xp[:, kh:kh + H, kw:kw + W, :]
            for kh in range(KH) for kw in range(KW)]
    patches_ref = jnp.concatenate(cols, axis=-1).reshape(B, HW, KC)
    wc_ref = jnp.transpose(w_conv, (2, 3, 1, 0)).reshape(KC, FEAT_DIM)
    conv_ref = jnp.maximum(
        jnp.einsum("bpk,kf->bpf", patches_ref, wc_ref) + b_conv, 0.0)
    feat_ref = conv_ref.mean(axis=1)
    y_ref = feat_ref @ w_head.T + b_head

    assert y.shape == (B, NUM_CLASSES)
    assert jnp.allclose(y, y_ref, atol=1e-4, rtol=1e-4), "mismatch vs reference"

    print("KERNEL_OK")
</pallas_src>

<mosaic_0001>
module attributes {stable_mosaic.version = 11 : i64} {
  func.func @_fixed_feature_mlp_kernel(%arg0: memref<512x128xf32, #tpu.memory_space<vmem>>, %arg1: memref<128x128xf32, #tpu.memory_space<vmem>>, %arg2: memref<1x128xf32, #tpu.memory_space<vmem>>, %arg3: memref<128x128xf32, #tpu.memory_space<vmem>>, %arg4: memref<1x128xf32, #tpu.memory_space<vmem>>, %arg5: memref<2x128xf32, #tpu.memory_space<vmem>>) attributes {dimension_semantics = [], scalar_prefetch = 0 : i64, scratch_operands = 0 : i64, tpu.core_type = #tpu.core_type<tc>} {
    %c0 = arith.constant 0 : index
    %c0_0 = arith.constant 0 : index
    %0 = vector.load %arg0[%c0, %c0_0] : memref<512x128xf32, #tpu.memory_space<vmem>>, vector<512x128xf32>
    %c0_1 = arith.constant 0 : index
    %c0_2 = arith.constant 0 : index
    %1 = vector.load %arg1[%c0_1, %c0_2] : memref<128x128xf32, #tpu.memory_space<vmem>>, vector<128x128xf32>
    %cst = arith.constant dense<0.000000e+00> : vector<512x128xf32>
    %2 = tpu.matmul %0, %1, %cst {dimension_numbers = #tpu.dot_dimension_numbers<[1], [0], [0], [1], [0, 0, 1, 1], [], []>} : vector<512x128xf32>, vector<128x128xf32>, vector<512x128xf32> -> vector<512x128xf32>
    %c0_3 = arith.constant 0 : index
    %c0_4 = arith.constant 0 : index
    %3 = vector.load %arg2[%c0_3, %c0_4] : memref<1x128xf32, #tpu.memory_space<vmem>>, vector<1x128xf32>
    %4 = vector.broadcast %3 : vector<1x128xf32> to vector<512x128xf32>
    %5 = arith.addf %2, %4 : vector<512x128xf32>
    %cst_5 = arith.constant 0.000000e+00 : f32
    %6 = vector.broadcast %cst_5 : f32 to vector<512x128xf32>
    %7 = arith.maximumf %5, %6 : vector<512x128xf32>
    %8 = vector.extract_strided_slice %7 {offsets = [0, 0], sizes = [256, 128], strides = [1, 1]} : vector<512x128xf32> to vector<256x128xf32>
    %cst_6 = arith.constant dense<0.000000e+00> : vector<128xf32>
    %9 = vector.multi_reduction <add>, %8, %cst_6 [0] : vector<256x128xf32> to vector<128xf32>
    %10 = vector.shape_cast %9 : vector<128xf32> to vector<1x128xf32>
    %cst_7 = arith.constant 2.560000e+02 : f32
    %11 = vector.broadcast %cst_7 : f32 to vector<1x128xf32>
    %12 = arith.divf %10, %11 : vector<1x128xf32>
    %13 = vector.extract_strided_slice %7 {offsets = [256, 0], sizes = [256, 128], strides = [1, 1]} : vector<512x128xf32> to vector<256x128xf32>
    %cst_8 = arith.constant dense<0.000000e+00> : vector<128xf32>
    %14 = vector.multi_reduction <add>, %13, %cst_8 [0] : vector<256x128xf32> to vector<128xf32>
    %15 = vector.shape_cast %14 : vector<128xf32> to vector<1x128xf32>
    %cst_9 = arith.constant 2.560000e+02 : f32
    %16 = vector.broadcast %cst_9 : f32 to vector<1x128xf32>
    %17 = arith.divf %15, %16 : vector<1x128xf32>
    %18 = tpu.concatenate %12, %17 in 0 : vector<1x128xf32>, vector<1x128xf32> -> vector<2x128xf32>
    %c0_10 = arith.constant 0 : index
    %c0_11 = arith.constant 0 : index
    %19 = vector.load %arg3[%c0_10, %c0_11] : memref<128x128xf32, #tpu.memory_space<vmem>>, vector<128x128xf32>
    %cst_12 = arith.constant dense<0.000000e+00> : vector<2x128xf32>
    %20 = tpu.matmul %18, %19, %cst_12 {dimension_numbers = #tpu.dot_dimension_numbers<[1], [0], [0], [1], [0, 0, 1, 1], [], []>} : vector<2x128xf32>, vector<128x128xf32>, vector<2x128xf32> -> vector<2x128xf32>
    %c0_13 = arith.constant 0 : index
    %c0_14 = arith.constant 0 : index
    %21 = vector.load %arg4[%c0_13, %c0_14] : memref<1x128xf32, #tpu.memory_space<vmem>>, vector<1x128xf32>
    %22 = vector.broadcast %21 : vector<1x128xf32> to vector<2x128xf32>
    %23 = arith.addf %20, %22 : vector<2x128xf32>
    %c0_15 = arith.constant 0 : index
    %c0_16 = arith.constant 0 : index
    %24 = vector.load %arg5[%c0_15, %c0_16] : memref<2x128xf32, #tpu.memory_space<vmem>>, vector<2x128xf32>
    tpu.vector_store %arg5[%c0_15, %c0_16], %23 {strides = array<i32>} : memref<2x128xf32, #tpu.memory_space<vmem>>, vector<2x128xf32>,
    return
  }
}

</mosaic_0001>

<bundles_post_ra>
// kernel: fixed_feature_mlp.1
= control target key start
LH: loop header
LB: loop body
LE: loop exit
PB: predicated region body
PF: predicated region fallthrough
CT: control target
= control target key end

     0   :  { %s1614_s0 = inlined_call_operand.vmem [shape: f32[512,128], index: 0, kind: input, shape index: {}]   ;;  %s1615_s1 = inlined_call_operand.vmem [shape: f32[128,128], index: 1, kind: input, shape index: {}]   ;;  %s1616_s2 = inlined_call_operand.vmem [shape: f32[1,128], index: 2, kind: input, shape index: {}]   ;;  %s1617_s3 = inlined_call_operand.vmem [shape: f32[128,128], index: 3, kind: input, shape index: {}]   ;;  %s1618_s4 = inlined_call_operand.vmem [shape: f32[1,128], index: 4, kind: input, shape index: {}]   ;;  %s1619_s5 = inlined_call_operand.hbm [shape: f32[2,128], index: 5, kind: output, shape index: {}]  }
   0x1   :  { %v85_v0 = vld [vmem:[%s1615_s1] sm:$0xff]  ;;  %v86_v1 = vld [vmem:[%s1615_s1 + $0x8] sm:$0xff]  ;;  %v87_v2 = vld [vmem:[%s1615_s1 + $0x10] sm:$0xff] }
   0x2   :  { %v1006_v3 = vpack.c.bf16 %v86_v1, %v85_v0  ;;  %v88_v4 = vld [vmem:[%s1615_s1 + $0x18] sm:$0xff]  ;;  %v89_v6 = vld [vmem:[%s1615_s1 + $0x20] sm:$0xff]  ;;  %v90_v7 = vld [vmem:[%s1615_s1 + $0x28] sm:$0xff] }
   0x3   :  { %v1010_v5 = vpack.c.bf16 %v88_v4, %v87_v2  ;;  %v1014_v8 = vpack.c.bf16 %v90_v7, %v89_v6  ;;  %v21_v9 = vld [vmem:[%s1614_s0] sm:$0xff]  ;;  %v91_v10 = vld [vmem:[%s1615_s1 + $0x30] sm:$0xff]  ;;  %v92_v11 = vld [vmem:[%s1615_s1 + $0x38] sm:$0xff] }
   0x4   :  { %1007 = vmatprep.subr.bf16.mxu0 %v1006_v3  ;;  %1062 = vmatprep.subr.bf16.mxu1 %v1006_v3  ;;  %v1018_v12 = vpack.c.bf16 %v92_v11, %v91_v10  ;;  %v93_v13 = vld [vmem:[%s1615_s1 + $0x40] sm:$0xff]  ;;  %v94_v14 = vld [vmem:[%s1615_s1 + $0x48] sm:$0xff]  ;;  %v95_v16 = vld [vmem:[%s1615_s1 + $0x50] sm:$0xff] }
   0x5   :  { %1009 = vmatpush3.bf16.msra.mxu0 %v1006_v3  ;;  %1070 = vmatpush3.bf16.msra.mxu1 %v1006_v3  ;;  %v1022_v15 = vpack.c.bf16 %v94_v14, %v93_v13  ;;  %v96_v17 = vld [vmem:[%s1615_s1 + $0x58] sm:$0xff]  ;;  %v55_v18 = vld [vmem:[%s1614_s0 + $0x110] sm:$0xff]  ;;  %v97_v20 = vld [vmem:[%s1615_s1 + $0x60] sm:$0xff] }
   0x6   :  { %1011 = vmatprep.subr.bf16.mxu0 %v1010_v5  ;;  %1063 = vmatprep.subr.bf16.mxu1 %v1010_v5  ;;  %v1026_v19 = vpack.c.bf16 %v96_v17, %v95_v16  ;;  %v98_v21 = vld [vmem:[%s1615_s1 + $0x68] sm:$0xff]  ;;  %v99_v23 = vld [vmem:[%s1615_s1 + $0x70] sm:$0xff]  ;;  %v100_v24 = vld [vmem:[%s1615_s1 + $0x78] sm:$0xff] }
   0x7   :  { %875 = vmatprep.mubr.f32.mxu0 %v21_v9  ;;  %926 = vmatprep.mubr.f32.mxu1 %v55_v18  ;;  %v1030_v22 = vpack.c.bf16 %v98_v21, %v97_v20  ;;  %v1034_v25 = vpack.c.bf16 %v100_v24, %v99_v23 }
   0x9   :  { %1013 = vmatpush3.bf16.msra.mxu0 %v1010_v5  ;;  %1071 = vmatpush3.bf16.msra.mxu1 %v1010_v5 }
   0xa   :  { %1015 = vmatprep.subr.bf16.mxu0 %v1014_v8  ;;  %1064 = vmatprep.subr.bf16.mxu1 %v1014_v8 }
   0xd   :  { %1017 = vmatpush3.bf16.msra.mxu0 %v1014_v8  ;;  %1072 = vmatpush3.bf16.msra.mxu1 %v1014_v8 }
   0xe   :  { %1019 = vmatprep.subr.bf16.mxu0 %v1018_v12  ;;  %1065 = vmatprep.subr.bf16.mxu1 %v1018_v12 }
  0x11   :  { %1021 = vmatpush3.bf16.msra.mxu0 %v1018_v12  ;;  %1073 = vmatpush3.bf16.msra.mxu1 %v1018_v12 }
  0x12   :  { %1023 = vmatprep.subr.bf16.mxu0 %v1022_v15  ;;  %1066 = vmatprep.subr.bf16.mxu1 %v1022_v15 }
  0x15   :  { %1025 = vmatpush3.bf16.msra.mxu0 %v1022_v15  ;;  %1074 = vmatpush3.bf16.msra.mxu1 %v1022_v15 }
  0x16   :  { %1027 = vmatprep.subr.bf16.mxu0 %v1026_v19  ;;  %1067 = vmatprep.subr.bf16.mxu1 %v1026_v19 }
  0x19   :  { %1029 = vmatpush3.bf16.msra.mxu0 %v1026_v19  ;;  %1075 = vmatpush3.bf16.msra.mxu1 %v1026_v19 }
  0x1a   :  { %1031 = vmatprep.subr.bf16.mxu0 %v1030_v22  ;;  %1068 = vmatprep.subr.bf16.mxu1 %v1030_v22 }
  0x1b   :  { %10 = vsyncpa [#allocation3], 0  ;;  %v22_v26 = vld [vmem:[%s1614_s0 + $0x8] sm:$0xff]  ;;  %v56_v27 = vld [vmem:[%s1614_s0 + $0x118] sm:$0xff]  ;;  %vm1107_vm0 = vmmov 0   ;;  %vm634_vm1 = vcmask 1040384  }
  0x1c   :  { %v23_v28 = vld [vmem:[%s1614_s0 + $0x10] sm:$0xff]  ;;  %v57_v29 = vld [vmem:[%s1614_s0 + $0x120] sm:$0xff]  ;;  %v24_v30 = vld [vmem:[%s1614_s0 + $0x18] sm:$0xff]  ;;  %s1109_s29 = smov [#allocation2]  }
  0x1d   :  { %1033 = vmatpush3.bf16.msra.mxu0 %v1030_v22  ;;  %1076 = vmatpush3.bf16.msra.mxu1 %v1030_v22  ;;  %v58_v31 = vld [vmem:[%s1614_s0 + $0x128] sm:$0xff]  ;;  %v25_v32 = vld [vmem:[%s1614_s0 + $0x20] sm:$0xff]  ;;  %v59_v33 = vld [vmem:[%s1614_s0 + $0x130] sm:$0xff]  ;;  %s736_s30 = sshll.u32 %s1109_s29, 4  ;;  %s737_s30 = int_to_ptr.vmem [resolvable:$true] %s736_s30 }
  0x1e   :  { %1035 = vmatprep.subr.bf16.mxu0 %v1034_v25  ;;  %1069 = vmatprep.subr.bf16.mxu1 %v1034_v25  ;;  %v26_v34 = vld [vmem:[%s1614_s0 + $0x28] sm:$0xff]  ;;  %v60_v35 = vld [vmem:[%s1614_s0 + $0x138] sm:$0xff]  ;;  %v27_v36 = vld [vmem:[%s1614_s0 + $0x30] sm:$0xff]  ;;  %s1082_s6 = scalar_lea.vmem %s737_s30, 32  ;;  %p1087_p1 = scmp.lt.s32.totalorder %s737_s30, %s737_s30 }
  0x1f   :  { %v61_v37 = vld [vmem:[%s1614_s0 + $0x140] sm:$0xff]  ;;  %v28_v38 = vld [vmem:[%s1614_s0 + $0x38] sm:$0xff]  ;;  %v62_v39 = vld [vmem:[%s1614_s0 + $0x148] sm:$0xff]  ;;  %p1083_p0 = scmp.ne.s32.totalorder %s737_s30, %s1082_s6  ;;  %p1088_p2 = scmp.lt.s32.totalorder %s1082_s6, %s1082_s6 }
  0x20   :  { %v29_v40 = vld [vmem:[%s1614_s0 + $0x40] sm:$0xff]  ;;  %v63_v41 = vld [vmem:[%s1614_s0 + $0x150] sm:$0xff]  ;;  %v30_v42 = vld [vmem:[%s1614_s0 + $0x48] sm:$0xff] }
  0x21   :  { %1037 = vmatpush3.bf16.msra.mxu0 %v1034_v25  ;;  %1077 = vmatpush3.bf16.msra.mxu1 %v1034_v25  ;;  %v64_v43 = vld [vmem:[%s1614_s0 + $0x158] sm:$0xff]  ;;  %v31_v44 = vld [vmem:[%s1614_s0 + $0x50] sm:$0xff]  ;;  %v65_v45 = vld [vmem:[%s1614_s0 + $0x160] sm:$0xff]  ;;  %p1089_p3 = por %p1088_p2, %p1087_p1 }
  0x22   :  { %v32_v46 = vld [vmem:[%s1614_s0 + $0x58] sm:$0xff]  ;;  %v66_v47 = vld [vmem:[%s1614_s0 + $0x168] sm:$0xff]  ;;  %v33_v48 = vld [vmem:[%s1614_s0 + $0x60] sm:$0xff] }
  0x23   :  { %v67_v49 = vld [vmem:[%s1614_s0 + $0x170] sm:$0xff]  ;;  %v34_v50 = vld [vmem:[%s1614_s0 + $0x68] sm:$0xff]  ;;  %v68_v51 = vld [vmem:[%s1614_s0 + $0x178] sm:$0xff]  ;;  %p1090_p4 = pnand %p1089_p3, %p1083_p0 }
  0x24   :  { %876 = vmatmul.mubr.f32.vlgmr.msra.gmra.mrb[0].mxu0 %v22_v26  ;;  %927 = vmatmul.mubr.f32.vlgmr.msra.gmra.mrb[0].mxu1 %v56_v27  ;;  %v35_v52 = vld [vmem:[%s1614_s0 + $0x70] sm:$0xff]  ;;  %v69_v53 = vld [vmem:[%s1614_s0 + $0x180] sm:$0xff]  ;;  %v36_v54 = vld [vmem:[%s1614_s0 + $0x78] sm:$0xff]  ;;  %v1106_v26 = vmov 0.0|0.0  }
  0x25   :  { %878 = vmatprep.mubr.f32.mxu0 %v23_v28  ;;  %929 = vmatprep.mubr.f32.mxu1 %v57_v29  ;;  %v70_v55 = vld [vmem:[%s1614_s0 + $0x188] sm:$0xff]  ;;  %v37_v56 = vld [vmem:[%s1614_s0 + $0x80] sm:$0xff]  ;;  %v71_v57 = vld [vmem:[%s1614_s0 + $0x190] sm:$0xff] }
  0x26   :  { %v38_v58 = vld [vmem:[%s1614_s0 + $0x88] sm:$0xff]  ;;  %v72_v59 = vld [vmem:[%s1614_s0 + $0x198] sm:$0xff]  ;;  %v39_v60 = vld [vmem:[%s1614_s0 + $0x90] sm:$0xff]  ;;  %1038 = vmatprep.subr.bf16.mxu1 %v1106_v26 }
  0x27   :  { %v73_v61 = vld [vmem:[%s1614_s0 + $0x1a0] sm:$0xff]  ;;  %v40_v62 = vld [vmem:[%s1614_s0 + $0x98] sm:$0xff]  ;;  %v74_v63 = vld [vmem:[%s1614_s0 + $0x1a8] sm:$0xff] }
  0x28   :  { %879 = vmatmul.mubr.f32.gmra.mrb[2].mxu0 %v24_v30  ;;  %930 = vmatmul.mubr.f32.gmra.mrb[2].mxu1 %v58_v31  ;;  %v41_v0 = vld [vmem:[%s1614_s0 + $0xa0] sm:$0xff]  ;;  %v75_v1 = vld [vmem:[%s1614_s0 + $0x1b0] sm:$0xff]  ;;  %v42_v2 = vld [vmem:[%s1614_s0 + $0xa8] sm:$0xff] }
  0x29   :  { %881 = vmatprep.mubr.f32.mxu0 %v25_v32  ;;  %932 = vmatprep.mubr.f32.mxu1 %v59_v33  ;;  %v76_v3 = vld [vmem:[%s1614_s0 + $0x1b8] sm:$0xff]  ;;  %v43_v4 = vld [vmem:[%s1614_s0 + $0xb0] sm:$0xff]  ;;  %v77_v5 = vld [vmem:[%s1614_s0 + $0x1c0] sm:$0xff] }
  0x2a   :  { %v44_v6 = vld [vmem:[%s1614_s0 + $0xb8] sm:$0xff]  ;;  %v78_v7 = vld [vmem:[%s1614_s0 + $0x1c8] sm:$0xff]  ;;  %v45_v8 = vld [vmem:[%s1614_s0 + $0xc0] sm:$0xff] }
  0x2b   :  { %v79_v9 = vld [vmem:[%s1614_s0 + $0x1d0] sm:$0xff]  ;;  %v46_v10 = vld [vmem:[%s1614_s0 + $0xc8] sm:$0xff]  ;;  %v80_v11 = vld [vmem:[%s1614_s0 + $0x1d8] sm:$0xff] }
  0x2c   :  { %882 = vmatmul.mubr.f32.gmra.mrb[4].mxu0 %v26_v34  ;;  %933 = vmatmul.mubr.f32.gmra.mrb[4].mxu1 %v60_v35  ;;  %v47_v12 = vld [vmem:[%s1614_s0 + $0xd0] sm:$0xff]  ;;  %v81_v13 = vld [vmem:[%s1614_s0 + $0x1e0] sm:$0xff]  ;;  %v48_v14 = vld [vmem:[%s1614_s0 + $0xd8] sm:$0xff] }
  0x2d   :  { %884 = vmatprep.mubr.f32.mxu0 %v27_v36  ;;  %935 = vmatprep.mubr.f32.mxu1 %v61_v37  ;;  %v82_v15 = vld [vmem:[%s1614_s0 + $0x1e8] sm:$0xff]  ;;  %v49_v16 = vld [vmem:[%s1614_s0 + $0xe0] sm:$0xff]  ;;  %v83_v17 = vld [vmem:[%s1614_s0 + $0x1f0] sm:$0xff] }
  0x2e   :  { %v50_v18 = vld [vmem:[%s1614_s0 + $0xe8] sm:$0xff]  ;;  %v84_v19 = vld [vmem:[%s1614_s0 + $0x1f8] sm:$0xff]  ;;  %v51_v20 = vld [vmem:[%s1614_s0 + $0xf0] sm:$0xff] }
  0x2f   :  { %v52_v21 = vld [vmem:[%s1614_s0 + $0xf8] sm:$0xff]  ;;  %v53_v22 = vld [vmem:[%s1614_s0 + $0x100] sm:$0xff]  ;;  %v54_v23 = vld [vmem:[%s1614_s0 + $0x108] sm:$0xff] }
  0x30   :  { %885 = vmatmul.mubr.f32.gmra.mrb[6].mxu0 %v28_v38  ;;  %936 = vmatmul.mubr.f32.gmra.mrb[6].mxu1 %v62_v39  ;;  %v636_v24 = vld [vmem:[%s1617_s3] sm:$0xff]  ;;  %v637_v25 = vld [vmem:[%s1617_s3 + $0x8] sm:$0xff]  ;;  %v638_v28 = vld [vmem:[%s1617_s3 + $0x10] sm:$0xff] }
  0x31   :  { %887 = vmatprep.mubr.f32.mxu0 %v29_v40  ;;  %938 = vmatprep.mubr.f32.mxu1 %v63_v41  ;;  %v1039_v27 = vpack.c.bf16 %v637_v25, %v636_v24  ;;  %v639_v29 = vld [vmem:[%s1617_s3 + $0x18] sm:$0xff]  ;;  %v640_v31 = vld [vmem:[%s1617_s3 + $0x20] sm:$0xff]  ;;  %v641_v32 = vld [vmem:[%s1617_s3 + $0x28] sm:$0xff] }
  0x32   :  { %v1042_v30 = vpack.c.bf16 %v639_v29, %v638_v28  ;;  %v1045_v33 = vpack.c.bf16 %v641_v32, %v640_v31  ;;  %v642_v34 = vld [vmem:[%s1617_s3 + $0x30] sm:$0xff]  ;;  %v643_v35 = vld [vmem:[%s1617_s3 + $0x38] sm:$0xff]  ;;  %v644_v37 = vld [vmem:[%s1617_s3 + $0x40] sm:$0xff] }
  0x33   :  { %1040 = vmatpush3.bf16.msra.mxu1 %v1039_v27  ;;  %v1048_v36 = vpack.c.bf16 %v643_v35, %v642_v34  ;;  %v645_v38 = vld [vmem:[%s1617_s3 + $0x48] sm:$0xff]  ;;  %v1419_v40 = vld [vmem:[%s1616_s2] ss:$0 sm:$0xff] }
  0x34   :  { %888 = vmatmul.mubr.f32.gmra.mrb[8].mxu0 %v30_v42  ;;  %939 = vmatmul.mubr.f32.gmra.mrb[8].mxu1 %v64_v43  ;;  %v1051_v39 = vpack.c.bf16 %v645_v38, %v644_v37 }
  0x35   :  { %890 = vmatprep.mubr.f32.mxu0 %v31_v44  ;;  %941 = vmatprep.mubr.f32.mxu1 %v65_v45 }
  0x36   :  { %1041 = vmatprep.subr.bf16.mxu1 %v1106_v26 }
  0x37   :  { %1043 = vmatpush3.bf16.msra.mxu1 %v1042_v30 }
  0x38   :  { %891 = vmatmul.mubr.f32.gmra.mrb[10].mxu0 %v32_v46  ;;  %942 = vmatmul.mubr.f32.gmra.mrb[10].mxu1 %v66_v47 }
  0x39   :  { %893 = vmatprep.mubr.f32.mxu0 %v33_v48  ;;  %944 = vmatprep.mubr.f32.mxu1 %v67_v49 }
  0x3a   :  { %1044 = vmatprep.subr.bf16.mxu1 %v1106_v26 }
  0x3b   :  { %1046 = vmatpush3.bf16.msra.mxu1 %v1045_v33 }
  0x3c   :  { %894 = vmatmul.mubr.f32.gmra.mrb[12].mxu0 %v34_v50  ;;  %945 = vmatmul.mubr.f32.gmra.mrb[12].mxu1 %v68_v51 }
  0x3d   :  { %896 = vmatprep.mubr.f32.mxu0 %v35_v52  ;;  %947 = vmatprep.mubr.f32.mxu1 %v69_v53  ;;  %v646_v53 = vld [vmem:[%s1617_s3 + $0x50] sm:$0xff] }
  0x3e   :  { %1047 = vmatprep.subr.bf16.mxu1 %v1106_v26 }
  0x3f   :  { %1049 = vmatpush3.bf16.msra.mxu1 %v1048_v36 }
  0x40   :  { %897 = vmatmul.mubr.f32.gmra.mrb[14].mxu0 %v36_v54  ;;  %948 = vmatmul.mubr.f32.gmra.mrb[14].mxu1 %v70_v55  ;;  %v647_v54 = vld [vmem:[%s1617_s3 + $0x58] sm:$0xff] }
  0x41   :  { %899 = vmatprep.mubr.f32.mxu0 %v37_v56  ;;  %950 = vmatprep.mubr.f32.mxu1 %v71_v57 }
  0x42   :  { %1050 = vmatprep.subr.bf16.mxu1 %v1106_v26 }
  0x43   :  { %1052 = vmatpush3.bf16.msra.mxu1 %v1051_v39 }
  0x44   :  { %900 = vmatmul.mubr.f32.gmra.mrb[16].mxu0 %v38_v58  ;;  %951 = vmatmul.mubr.f32.gmra.mrb[16].mxu1 %v72_v59  ;;  %v1054_v58 = vpack.c.bf16 %v647_v54, %v646_v53 }
  0x45   :  { %902 = vmatprep.mubr.f32.mxu0 %v39_v60  ;;  %953 = vmatprep.mubr.f32.mxu1 %v73_v61 }
  0x46   :  { %1053 = vmatprep.subr.bf16.mxu1 %v1106_v26 }
  0x47   :  { %1055 = vmatpush3.bf16.msra.mxu1 %v1054_v58 }
  0x48   :  { %903 = vmatmul.mubr.f32.gmra.mrb[18].mxu0 %v40_v62  ;;  %954 = vmatmul.mubr.f32.gmra.mrb[18].mxu1 %v74_v63 }
  0x49   :  { %905 = vmatprep.mubr.f32.mxu0 %v41_v0  ;;  %956 = vmatprep.mubr.f32.mxu1 %v75_v1  ;;  %v648_v1 = vld [vmem:[%s1617_s3 + $0x60] sm:$0xff] }
  0x4a   :  { %1056 = vmatprep.subr.bf16.mxu1 %v1106_v26 }
  0x4c   :  { %906 = vmatmul.mubr.f32.gmra.mrb[20].mxu0 %v42_v2  ;;  %957 = vmatmul.mubr.f32.gmra.mrb[20].mxu1 %v76_v3  ;;  %v649_v2 = vld [vmem:[%s1617_s3 + $0x68] sm:$0xff] }
  0x4d   :  { %908 = vmatprep.mubr.f32.mxu0 %v43_v4  ;;  %959 = vmatprep.mubr.f32.mxu1 %v77_v5 }
  0x50   :  { %909 = vmatmul.mubr.f32.gmra.mrb[22].mxu0 %v44_v6  ;;  %960 = vmatmul.mubr.f32.gmra.mrb[22].mxu1 %v78_v7  ;;  %v1057_v6 = vpack.c.bf16 %v649_v2, %v648_v1 }
  0x51   :  { %911 = vmatprep.mubr.f32.mxu0 %v45_v8  ;;  %962 = vmatprep.mubr.f32.mxu1 %v79_v9 }
  0x52   :  { %1058 = vmatpush3.bf16.msra.mxu1 %v1057_v6 }
  0x53   :  { %1059 = vmatprep.subr.bf16.mxu1 %v1106_v26 }
  0x54   :  { %912 = vmatmul.mubr.f32.gmra.mrb[24].mxu0 %v46_v10  ;;  %963 = vmatmul.mubr.f32.gmra.mrb[24].mxu1 %v80_v11  ;;  %v650_v11 = vld [vmem:[%s1617_s3 + $0x70] sm:$0xff] }
  0x55   :  { %914 = vmatprep.mubr.f32.mxu0 %v47_v12  ;;  %965 = vmatprep.mubr.f32.mxu1 %v81_v13  ;;  %v651_v12 = vld [vmem:[%s1617_s3 + $0x78] sm:$0xff] }
  0x58   :  { %915 = vmatmul.mubr.f32.gmra.mrb[26].mxu0 %v48_v14  ;;  %966 = vmatmul.mubr.f32.gmra.mrb[26].mxu1 %v82_v15 }
  0x59   :  { %917 = vmatprep.mubr.f32.mxu0 %v49_v16  ;;  %968 = vmatprep.mubr.f32.mxu1 %v83_v17  ;;  %v1060_v16 = vpack.c.bf16 %v651_v12, %v650_v11 }
  0x5b   :  { %1061 = vmatpush3.bf16.msra.mxu1 %v1060_v16 }
  0x5c   :  { %918 = vmatmul.mubr.f32.gmra.mrb[28].mxu0 %v50_v18  ;;  %969 = vmatmul.mubr.f32.gmra.mrb[28].mxu1 %v84_v19 }
  0x5d   :  { %920 = vmatprep.mubr.f32.mxu0 %v51_v20  ;;  %v1108_v20 = vmov 0.0  }
  0x5e   :  { %1003 = vmatprep.mubr.msk.f32.mxu1 %vm1107_vm0, %v1108_v20 }
  0x60   :  { %921 = vmatmul.mubr.f32.gmra.mrb[30].mxu0 %v52_v21 }
  0x61   :  { %923 = vmatprep.mubr.f32.mxu0 %v53_v22 }
  0x64   :  { %924 = vmatmul.mubr.f32.gmra.mrb[32].mxu0 %v54_v23 }
  0xf7   :  { %v877_v41 = vpop.f32.mrb[0].mxu0  ;;  %v1421_v42 = vpop.f32.mrb[0].mxu1 }
  0xf8   :  { %v180_v43 = vadd.f32 %v877_v41, %v1419_v40  ;;  %v174_v44 = vpop.f32.mrb[1].mxu0  ;;  %v1424_v45 = vpop.f32.mrb[1].mxu1 }
  0xf9   :  { %v175_v46 = vadd.f32 %v1419_v40, %v174_v44 }
  0xfa   :  { %v494_v47 = vmax.f32 %v180_v43, 0.0 }
  0xfb   :  { %v493_v48 = vmax.f32 %v175_v46, 0.0  ;;  %v880_v49 = vpop.f32.mrb[2].mxu0  ;;  %v1427_v50 = vpop.f32.mrb[2].mxu1 }
  0xfc   :  { %v184_v51 = vpop.f32.mrb[3].mxu0  ;;  %v1429_v52 = vpop.f32.mrb[3].mxu1  ;;  %v190_v56 = vadd.f32 %v880_v49, %v1419_v40 }
  0xfd   :  { %v557_v55 = vadd.f32 %v494_v47, %v493_v48  ;;  %v185_v57 = vadd.f32 %v1419_v40, %v184_v51 }
  0xfe   :  { %v496_v3 = vmax.f32 %v190_v56, 0.0 }
  0xff   :  { %v495_v59 = vmax.f32 %v185_v57, 0.0  ;;  %v883_v60 = vpop.f32.mrb[4].mxu0  ;;  %v1439_v61 = vpop.f32.mrb[4].mxu1 }
 0x100   :  { %v200_v62 = vadd.f32 %v883_v60, %v1419_v40  ;;  %v194_v63 = vpop.f32.mrb[5].mxu0  ;;  %v1442_v0 = vpop.f32.mrb[5].mxu1 }
 0x101   :  { %v558_v4 = vadd.f32 %v557_v55, %v495_v59  ;;  %v195_v5 = vadd.f32 %v1419_v40, %v194_v63 }
 0x102   :  { %v498_v13 = vmax.f32 %v200_v62, 0.0 }
 0x103   :  { %v497_v7 = vmax.f32 %v195_v5, 0.0  ;;  %v559_v8 = vadd.f32 %v558_v4, %v496_v3  ;;  %v886_v9 = vpop.f32.mrb[6].mxu0  ;;  %v1452_v10 = vpop.f32.mrb[6].mxu1 }
 0x104   :  { %v204_v14 = vpop.f32.mrb[7].mxu0  ;;  %v1460_v15 = vpop.f32.mrb[7].mxu1  ;;  %v210_v18 = vadd.f32 %v886_v9, %v1419_v40 }
 0x105   :  { %v560_v17 = vadd.f32 %v559_v8, %v497_v7  ;;  %v205_v19 = vadd.f32 %v1419_v40, %v204_v14 }
 0x106   :  { %v500_v28 = vmax.f32 %v210_v18, 0.0 }
 0x107   :  { %v499_v21 = vmax.f32 %v205_v19, 0.0  ;;  %v561_v22 = vadd.f32 %v560_v17, %v498_v13  ;;  %v889_v23 = vpop.f32.mrb[8].mxu0  ;;  %v1465_v24 = vpop.f32.mrb[8].mxu1 }
 0x108   :  { %v214_v25 = vpop.f32.mrb[9].mxu0  ;;  %v1467_v27 = vpop.f32.mrb[9].mxu1  ;;  %v220_v29 = vadd.f32 %v889_v23, %v1419_v40 }
 0x109   :  { %v562_v26 = vadd.f32 %v561_v22, %v499_v21  ;;  %v215_v30 = vadd.f32 %v1419_v40, %v214_v25 }
 0x10a   :  { %v502_v37 = vmax.f32 %v220_v29, 0.0 }
 0x10b   :  { %v501_v31 = vmax.f32 %v215_v30, 0.0  ;;  %v563_v32 = vadd.f32 %v562_v26, %v500_v28  ;;  %v892_v33 = vpop.f32.mrb[10].mxu0  ;;  %v1471_v34 = vpop.f32.mrb[10].mxu1 }
 0x10c   :  { %v224_v35 = vpop.f32.mrb[11].mxu0  ;;  %v1473_v36 = vpop.f32.mrb[11].mxu1  ;;  %v230_v39 = vadd.f32 %v892_v33, %v1419_v40 }
 0x10d   :  { %v564_v38 = vadd.f32 %v563_v32, %v501_v31  ;;  %v225_v41 = vadd.f32 %v1419_v40, %v224_v35 }
 0x10e   :  { %v504_v51 = vmax.f32 %v230_v39, 0.0 }
 0x10f   :  { %v503_v43 = vmax.f32 %v225_v41, 0.0  ;;  %v565_v44 = vadd.f32 %v564_v38, %v502_v37  ;;  %v895_v46 = vpop.f32.mrb[12].mxu0  ;;  %v1477_v47 = vpop.f32.mrb[12].mxu1 }
 0x110   :  { %v234_v48 = vpop.f32.mrb[13].mxu0  ;;  %v1479_v49 = vpop.f32.mrb[13].mxu1  ;;  %v240_v54 = vadd.f32 %v895_v46, %v1419_v40 }
 0x111   :  { %v566_v53 = vadd.f32 %v565_v44, %v503_v43  ;;  %v235_v55 = vadd.f32 %v1419_v40, %v234_v48 }
 0x112   :  { %v506_v63 = vmax.f32 %v240_v54, 0.0 }
 0x113   :  { %v505_v56 = vmax.f32 %v235_v55, 0.0  ;;  %v567_v57 = vadd.f32 %v566_v53, %v504_v51  ;;  %v898_v58 = vpop.f32.mrb[14].mxu0  ;;  %v1483_v59 = vpop.f32.mrb[14].mxu1 }
 0x114   :  { %v244_v60 = vpop.f32.mrb[15].mxu0  ;;  %v1485_v62 = vpop.f32.mrb[15].mxu1  ;;  %v250_v2 = vadd.f32 %v898_v58, %v1419_v40 }
 0x115   :  { %v568_v1 = vadd.f32 %v567_v57, %v505_v56  ;;  %v245_v3 = vadd.f32 %v1419_v40, %v244_v60 }
 0x116   :  { %v508_v11 = vmax.f32 %v250_v2, 0.0 }
 0x117   :  { %v507_v4 = vmax.f32 %v245_v3, 0.0  ;;  %v569_v5 = vadd.f32 %v568_v1, %v506_v63  ;;  %v901_v6 = vpop.f32.mrb[16].mxu0  ;;  %v1489_v7 = vpop.f32.mrb[16].mxu1 }
 0x118   :  { %v254_v8 = vpop.f32.mrb[17].mxu0  ;;  %v1491_v9 = vpop.f32.mrb[17].mxu1  ;;  %v260_v13 = vadd.f32 %v901_v6, %v1419_v40 }
 0x119   :  { %v570_v12 = vadd.f32 %v569_v5, %v507_v4  ;;  %v255_v14 = vadd.f32 %v1419_v40, %v254_v8 }
 0x11a   :  { %v510_v22 = vmax.f32 %v260_v13, 0.0 }
 0x11b   :  { %v509_v16 = vmax.f32 %v255_v14, 0.0  ;;  %v571_v17 = vadd.f32 %v570_v12, %v508_v11  ;;  %v904_v18 = vpop.f32.mrb[18].mxu0  ;;  %v1495_v19 = vpop.f32.mrb[18].mxu1 }
 0x11c   :  { %v264_v20 = vpop.f32.mrb[19].mxu0  ;;  %v1497_v21 = vpop.f32.mrb[19].mxu1  ;;  %v270_v25 = vadd.f32 %v904_v18, %v1419_v40 }
 0x11d   :  { %v572_v23 = vadd.f32 %v571_v17, %v509_v16  ;;  %v265_v28 = vadd.f32 %v1419_v40, %v264_v20 }
 0x11e   :  { %v512_v35 = vmax.f32 %v270_v25, 0.0 }
 0x11f   :  { %v511_v26 = vmax.f32 %v265_v28, 0.0  ;;  %v573_v29 = vadd.f32 %v572_v23, %v510_v22  ;;  %v907_v30 = vpop.f32.mrb[20].mxu0  ;;  %v1501_v31 = vpop.f32.mrb[20].mxu1 }
 0x120   :  { %v274_v32 = vpop.f32.mrb[21].mxu0  ;;  %v1503_v33 = vpop.f32.mrb[21].mxu1  ;;  %v280_v38 = vadd.f32 %v907_v30, %v1419_v40 }
 0x121   :  { %v574_v37 = vadd.f32 %v573_v29, %v511_v26  ;;  %v275_v39 = vadd.f32 %v1419_v40, %v274_v32 }
 0x122   :  { %v514_v53 = vmax.f32 %v280_v38, 0.0 }
 0x123   :  { %v513_v41 = vmax.f32 %v275_v39, 0.0  ;;  %v575_v43 = vadd.f32 %v574_v37, %v512_v35  ;;  %v910_v44 = vpop.f32.mrb[22].mxu0  ;;  %v1507_v46 = vpop.f32.mrb[22].mxu1 }
 0x124   :  { %v284_v48 = vpop.f32.mrb[23].mxu0  ;;  %v1509_v51 = vpop.f32.mrb[23].mxu1  ;;  %v290_v55 = vadd.f32 %v910_v44, %v1419_v40 }
 0x125   :  { %v576_v54 = vadd.f32 %v575_v43, %v513_v41  ;;  %v285_v56 = vadd.f32 %v1419_v40, %v284_v48 }
 0x126   :  { %v516_v3 = vmax.f32 %v290_v55, 0.0 }
 0x127   :  { %v515_v57 = vmax.f32 %v285_v56, 0.0  ;;  %v577_v58 = vadd.f32 %v576_v54, %v514_v53  ;;  %v913_v60 = vpop.f32.mrb[24].mxu0  ;;  %v1513_v63 = vpop.f32.mrb[24].mxu1 }
 0x128   :  { %v294_v1 = vpop.f32.mrb[25].mxu0  ;;  %v1515_v2 = vpop.f32.mrb[25].mxu1  ;;  %v300_v5 = vadd.f32 %v913_v60, %v1419_v40  ;;  %v345_v60 = vadd.f32 %v1419_v40, %v1424_v45 }
 0x129   :  { %v578_v4 = vadd.f32 %v577_v58, %v515_v57  ;;  %v295_v6 = vadd.f32 %v1419_v40, %v294_v1 }
 0x12a   :  { %v518_v17 = vmax.f32 %v300_v5, 0.0 }
 0x12b   :  { %v517_v8 = vmax.f32 %v295_v6, 0.0  ;;  %v579_v11 = vadd.f32 %v578_v4, %v516_v3  ;;  %v916_v12 = vpop.f32.mrb[26].mxu0  ;;  %v1519_v13 = vpop.f32.mrb[26].mxu1 }
 0x12c   :  { %v304_v14 = vpop.f32.mrb[27].mxu0  ;;  %v1521_v16 = vpop.f32.mrb[27].mxu1  ;;  %v310_v20 = vadd.f32 %v916_v12, %v1419_v40 }
 0x12d   :  { %v580_v18 = vadd.f32 %v579_v11, %v517_v8  ;;  %v305_v22 = vadd.f32 %v1419_v40, %v304_v14  ;;  %v350_v11 = vadd.f32 %v1421_v42, %v1419_v40  ;;  %v370_v42 = vadd.f32 %v1439_v61, %v1419_v40 }
 0x12e   :  { %v520_v32 = vmax.f32 %v310_v20, 0.0  ;;  %v390_v61 = vadd.f32 %v1465_v24, %v1419_v40  ;;  %v410_v24 = vadd.f32 %v1477_v47, %v1419_v40  ;;  %v430_v47 = vadd.f32 %v1489_v7, %v1419_v40 }
 0x12f   :  { %v519_v23 = vmax.f32 %v305_v22, 0.0  ;;  %v581_v25 = vadd.f32 %v580_v18, %v518_v17  ;;  %v919_v28 = vpop.f32.mrb[28].mxu0  ;;  %v1525_v26 = vpop.f32.mrb[28].mxu1  ;;  %v527_v17 = vmax.f32 %v345_v60, 0.0  ;;  %v355_v18 = vadd.f32 %v1419_v40, %v1429_v52 }
 0x130   :  { %v314_v29 = vpop.f32.mrb[29].mxu0  ;;  %v1527_v30 = vpop.f32.mrb[29].mxu1  ;;  %v320_v37 = vadd.f32 %v919_v28, %v1419_v40  ;;  %v528_v45 = vmax.f32 %v350_v11, 0.0  ;;  %v365_v28 = vadd.f32 %v1419_v40, %v1442_v0  ;;  %v375_v52 = vadd.f32 %v1419_v40, %v1460_v15 }
 0x131   :  { %v582_v35 = vadd.f32 %v581_v25, %v519_v23  ;;  %v315_v38 = vadd.f32 %v1419_v40, %v314_v29  ;;  %v360_v23 = vadd.f32 %v1427_v50, %v1419_v40  ;;  %v529_v25 = vmax.f32 %v355_v18, 0.0 }
 0x132   :  { %v522_v48 = vmax.f32 %v320_v37, 0.0  ;;  %v531_v37 = vmax.f32 %v365_v28, 0.0  ;;  %v380_v50 = vadd.f32 %v1452_v10, %v1419_v40  ;;  %v385_v0 = vadd.f32 %v1419_v40, %v1467_v27 }
 0x133   :  { %v521_v39 = vmax.f32 %v315_v38, 0.0  ;;  %v583_v41 = vadd.f32 %v582_v35, %v520_v32  ;;  %v922_v43 = vpop.f32.mrb[30].mxu0  ;;  %v530_v32 = vmax.f32 %v360_v23, 0.0  ;;  %v395_v15 = vadd.f32 %v1419_v40, %v1473_v36 }
 0x134   :  { %v324_v44 = vpop.f32.mrb[31].mxu0  ;;  %v330_v54 = vadd.f32 %v922_v43, %v1419_v40  ;;  %v533_v43 = vmax.f32 %v375_v52, 0.0  ;;  %v400_v10 = vadd.f32 %v1471_v34, %v1419_v40  ;;  %v405_v27 = vadd.f32 %v1419_v40, %v1479_v49 }
 0x135   :  { %v584_v53 = vadd.f32 %v583_v41, %v521_v39  ;;  %v325_v55 = vadd.f32 %v1419_v40, %v324_v44  ;;  %v532_v39 = vmax.f32 %v370_v42, 0.0  ;;  %v415_v36 = vadd.f32 %v1419_v40, %v1485_v62 }
 0x136   :  { %v524_v4 = vmax.f32 %v330_v54, 0.0  ;;  %v535_v54 = vmax.f32 %v385_v0, 0.0  ;;  %v420_v34 = vadd.f32 %v1483_v59, %v1419_v40  ;;  %v425_v49 = vadd.f32 %v1419_v40, %v1491_v9 }
 0x137   :  { %v523_v56 = vmax.f32 %v325_v55, 0.0  ;;  %v585_v57 = vadd.f32 %v584_v53, %v522_v48  ;;  %v925_v58 = vpop.f32.mrb[32].mxu0  ;;  %v534_v48 = vmax.f32 %v380_v50, 0.0  ;;  %v541_v11 = vmax.f32 %v415_v36, 0.0 }
 0x138   :  { %v340_v1 = vadd.f32 %v925_v58, %v1419_v40  ;;  %v334_v3 = vpop.f32.mrb[33].mxu0  ;;  %v537_v58 = vmax.f32 %v395_v15, 0.0  ;;  %v435_v62 = vadd.f32 %v1419_v40, %v1497_v21  ;;  %v440_v59 = vadd.f32 %v1495_v19, %v1419_v40 }
 0x139   :  { %v586_v5 = vadd.f32 %v585_v57, %v523_v56  ;;  %v335_v6 = vadd.f32 %v1419_v40, %v334_v3  ;;  %v536_v56 = vmax.f32 %v390_v61, 0.0  ;;  %v445_v9 = vadd.f32 %v1419_v40, %v1503_v33 }
 0x13a   :  { %v526_v8 = vmax.f32 %v340_v1, 0.0  ;;  %v538_v1 = vmax.f32 %v400_v10, 0.0  ;;  %v450_v7 = vadd.f32 %v1501_v31, %v1419_v40  ;;  %v455_v21 = vadd.f32 %v1419_v40, %v1509_v51 }
 0x13b   :  { %v1539_v12 = vadd.f32 %v586_v5, %v524_v4  ;;  %v525_v14 = vmax.f32 %v335_v6, 0.0  ;;  %v539_v4 = vmax.f32 %v405_v27, 0.0  ;;  %v540_v6 = vmax.f32 %v410_v24, 0.0 }
 0x13c   :  { %v460_v19 = vadd.f32 %v1507_v46, %v1419_v40  ;;  %v465_v33 = vadd.f32 %v1419_v40, %v1515_v2  ;;  %v470_v31 = vadd.f32 %v1513_v63, %v1419_v40  ;;  %v475_v51 = vadd.f32 %v1419_v40, %v1521_v16 }
 0x13d   :  { %v596_v20 = vadd.f32 %v526_v8, %v525_v14  ;;  %v480_v61 = vadd.f32 %v1519_v13, %v1419_v40  ;;  %v588_v46 = vrot.slane %v1539_v12, 4  ;;  %v485_v2 = vadd.f32 %v1419_v40, %v1527_v30 }
 0x13e   :  { %v490_v16 = vadd.f32 %v1525_v26, %v1419_v40  ;;  %v745_v40 = vld [vmem:[%s1618_s4] ss:$0 sm:$0xff] }
 0x13f   :  { %v597_v22 = vadd.f32 %v596_v20, %v527_v17  ;;  %v542_v17 = vmax.f32 %v420_v34, 0.0  ;;  %v543_v20 = vmax.f32 %v425_v49, 0.0  ;;  %v554_v63 = vmax.f32 %v480_v61, 0.0 }
 0x140   :  { %v589_v15 = vadd.f32 %v588_v46, %v1539_v12 }
 0x141   :  { %v598_v29 = vadd.f32 %v597_v22, %v528_v45  ;;  %v544_v22 = vmax.f32 %v430_v47, 0.0 }
 0x142   :  { %v590_v10 = vrot.slane %v589_v15, 2 }
 0x143   :  { %v599_v35 = vadd.f32 %v598_v29, %v529_v25  ;;  %v545_v25 = vmax.f32 %v435_v62, 0.0  ;;  %v546_v29 = vmax.f32 %v440_v59, 0.0 }
 0x145   :  { %v600_v38 = vadd.f32 %v599_v35, %v530_v32  ;;  %v547_v32 = vmax.f32 %v445_v9, 0.0 }
 0x147   :  { %v601_v41 = vadd.f32 %v600_v38, %v531_v37  ;;  %v548_v37 = vmax.f32 %v450_v7, 0.0  ;;  %v549_v38 = vmax.f32 %v455_v21, 0.0 }
 0x149   :  { %v602_v44 = vadd.f32 %v601_v41, %v532_v39  ;;  %v550_v41 = vmax.f32 %v460_v19, 0.0 }
 0x14b   :  { %v603_v53 = vadd.f32 %v602_v44, %v533_v43  ;;  %v551_v43 = vmax.f32 %v465_v33, 0.0  ;;  %v552_v44 = vmax.f32 %v470_v31, 0.0 }
 0x14d   :  { %v604_v55 = vadd.f32 %v603_v53, %v534_v48  ;;  %v553_v53 = vmax.f32 %v475_v51, 0.0 }
 0x14f   :  { %v605_v57 = vadd.f32 %v604_v55, %v535_v54 }
 0x151   :  { %v606_v60 = vadd.f32 %v605_v57, %v536_v56  ;;  %v555_v56 = vmax.f32 %v485_v2, 0.0 }
 0x153   :  { %v607_v3 = vadd.f32 %v606_v60, %v537_v58  ;;  %v556_v58 = vmax.f32 %v490_v16, 0.0  ;;  %v591_v60 = vadd.f32 %v590_v10, %v589_v15 }
 0x155   :  { %v608_v5 = vadd.f32 %v607_v3, %v538_v1  ;;  %v592_v3 = vrot.slane %v591_v60, 1 }
 0x157   :  { %v609_v8 = vadd.f32 %v608_v5, %v539_v4  ;;  %v593_v5 = vadd.f32 %v592_v3, %v591_v60 }
 0x159   :  { %v610_v14 = vadd.f32 %v609_v8, %v540_v6  ;;  %v595_v12 = vmul.f32 0.00390625, %v593_v5 }
 0x15b   :  { %v611_v18 = vadd.f32 %v610_v14, %v541_v11 }
 0x15d   :  { %v612_v45 = vadd.f32 %v611_v18, %v542_v17 }
 0x15f   :  { %v613_v23 = vadd.f32 %v612_v45, %v543_v20 }
 0x161   :  { %v614_v28 = vadd.f32 %v613_v23, %v544_v22 }
 0x163   :  { %v615_v42 = vadd.f32 %v614_v28, %v545_v25 }
 0x165   :  { %v616_v35 = vadd.f32 %v615_v42, %v546_v29 }
 0x167   :  { %v617_v52 = vadd.f32 %v616_v35, %v547_v32 }
 0x169   :  { %v618_v39 = vadd.f32 %v617_v52, %v548_v37 }
 0x16b   :  { %v619_v50 = vadd.f32 %v618_v39, %v549_v38 }
 0x16d   :  { %v620_v0 = vadd.f32 %v619_v50, %v550_v41 }
 0x16f   :  { %v621_v48 = vadd.f32 %v620_v0, %v551_v43 }
 0x171   :  { %v622_v54 = vadd.f32 %v621_v48, %v552_v44 }
 0x173   :  { %v623_v55 = vadd.f32 %v622_v54, %v553_v53 }
 0x175   :  { %v624_v57 = vadd.f32 %v623_v55, %v554_v63 }
 0x177   :  { %v625_v13 = vadd.f32 %v624_v57, %v555_v56 }
 0x179   :  { %v626_v27 = vadd.f32 %v625_v13, %v556_v58 }
 0x17b   :  { %v627_v24 = vrot.slane %v626_v27, 4 }
 0x17d   :  { %v628_v1 = vadd.f32 %v627_v24, %v626_v27 }
 0x17f   :  { %v629_v4 = vrot.slane %v628_v1, 2 }
 0x181   :  { %v630_v30 = vadd.f32 %v629_v4, %v628_v1 }
 0x183   :  { %v631_v36 = vrot.slane %v630_v30, 1 }
 0x185   :  { %v632_v6 = vadd.f32 %v631_v36, %v630_v30 }
 0x187   :  { %v633_v8 = vmul.f32 0.00390625, %v632_v6 }
 0x189   :  { %v635_v34 = vsel %vm634_vm1, %v595_v12, %v633_v8 }
 0x18a   :  { %1004 = vmatmul.mubr.f32.vlgmr.msra.gmra.mrb[30].mxu1 %v635_v34 }
 0x25d   :  { %v725_v26 = vpop.f32.mrb[30].mxu1 }
 0x25e   :  { %v726_v11 = vadd.f32 %v745_v40, %v725_v26  ;;  %v1005_v49 = vpop.f32.mrb[31].mxu1 }
 0x260   :  { %729 = vst [vmem:[#allocation2] sm:$0x3] %v726_v11 }
 0x261   :  { %1093 = shalt.err (!%p1090_p4)
}
 0x262   :  { %s1094_s8 = scalar_lea.hbm %s1619_s5, 32 }
 0x263   :  { %p1095_p5 = scmp.ne.s32.totalorder %s1619_s5, %s1094_s8  ;;  %p1098_p6 = scmp.lt.u32.totalorder %s1094_s8, %s1619_s5 }
 0x265   :  { %p1100_p7 = pnand %p1098_p6, %p1095_p5 }
 0x267   :  { %1103 = shalt.err (!%p1100_p7)
}
 0x268   :  { %739 = dma.vmem_to_hbm [thread:$0]  %s737_s30, 32, %s1619_s5, [#allocation3]  }
 0x269   :  { %1104 = dma.done.wait [#allocation3], 32  }
 0x26a   :  { %1105 = vsyncadd [#allocation3], 4294967264 }
 0x26b   :  { %743 = vsyncpa [#allocation3], 1 }

</bundles_post_ra>
